<compile_context>
chip_gen: v6e
topology: v6e:2x2x1
jax: 0.10.0
libtpu: 0.0.40
codegen_flags: <defaults>
</compile_context>

<pallas_src>
import functools

import jax
import jax.numpy as jnp
from jax import lax
from jax.experimental import pallas as pl
from jax.experimental.pallas import tpu as pltpu


def _round_up(x, m):
    return ((x + m - 1) // m) * m


def _adapter_kernel(x_ref, gate_ref, w1_ref, b1_ref, w2_ref, b2_ref, o_ref):
    # gate = sigmoid(mask) is precomputed in the wrapper (hoisted out of the grid loop).
    gate = gate_ref[...]                                  # (1, H)  f32
    gated = x_ref[...].astype(jnp.float32) * gate         # (tm, H) f32  (residual, kept f32)

    # PyTorch Linear is x @ W.T with W in (out, in) layout: contract x's H axis
    # against the weight's axis 1 directly (no wrapper-side transpose needed).
    dn = (((1,), (1,)), ((), ()))

    # Linear1 + ReLU  (bf16 MXU operands, f32 accumulation)
    h = lax.dot_general(gated.astype(w1_ref.dtype), w1_ref[...], dn,
                        preferred_element_type=jnp.float32)
    h = jnp.maximum(h + b1_ref[...], 0.0)

    # Linear2 + bias + gated-input residual (all adds in f32)
    y = lax.dot_general(h.astype(w2_ref.dtype), w2_ref[...], dn,
                        preferred_element_type=jnp.float32)
    y = y + b2_ref[...] + gated

    o_ref[...] = y.astype(o_ref.dtype)


def image_adapter(feature, mask, w1, b1, w2, b2, *,
                  tile_rows=256, matmul_dtype=jnp.bfloat16):
    """feature: (B, S, H); mask, b1, b2: (H,); w1, w2: (H, H) in PyTorch (out, in)
    layout. Returns (B, S, H) = adapter(sigmoid(mask)*feature) + sigmoid(mask)*feature."""
    B, S, H = feature.shape
    rows = B * S

    # Pick the row tile: large (MXU-filling) by default, but never larger than the
    # (8-aligned) number of rows; pad rows up so ragged B*S never forces tiny tiles.
    tile = min(tile_rows, _round_up(rows, 8))
    padded_rows = _round_up(rows, tile)

    x2d = feature.reshape(rows, H)
    if padded_rows != rows:
        x2d = jnp.pad(x2d, ((0, padded_rows - rows), (0, 0)))

    gate2d = jax.nn.sigmoid(mask.astype(jnp.float32)).reshape(1, H)   # hoisted sigmoid
    b1_2d = b1.astype(jnp.float32).reshape(1, H)
    b2_2d = b2.astype(jnp.float32).reshape(1, H)
    # Weights stay in PyTorch (out, in) layout; cast once for the MXU.
    w1_mm = w1.astype(matmul_dtype)
    w2_mm = w2.astype(matmul_dtype)
    # TODO(synk): for very large H on v7x (64 MiB VMEM), add a K/N tiling axis for
    # the weight blocks (3-D grid + f32 accumulator with pl.when init/finalize).

    grid = (padded_rows // tile,)

    # VMEM budget: single-buffered weights + double-buffered x/out tiles + slack.
    itemsize = jnp.dtype(matmul_dtype).itemsize
    weight_bytes = 2 * H * H * itemsize
    act_bytes = 2 * 2 * tile * H * 4          # x tile + out tile, double-buffered, f32
    scratch_bytes = 3 * tile * H * 4 + 4 * H * 4
    vmem_limit = int(min(weight_bytes + act_bytes + scratch_bytes + (8 << 20), 64 << 20))

    const_buf = pl.Buffered(1)                # weights/biases/gate never change per step

    out2d = pl.pallas_call(
        _adapter_kernel,
        out_shape=jax.ShapeDtypeStruct((padded_rows, H), feature.dtype),
        grid_spec=pltpu.PrefetchScalarGridSpec(
            num_scalar_prefetch=0,
            grid=grid,
            in_specs=[
                pl.BlockSpec((tile, H), lambda i: (i, 0)),                         # x tile
                pl.BlockSpec((1, H), lambda i: (0, 0), pipeline_mode=const_buf),   # gate
                pl.BlockSpec((H, H), lambda i: (0, 0), pipeline_mode=const_buf),   # w1
                pl.BlockSpec((1, H), lambda i: (0, 0), pipeline_mode=const_buf),   # b1
                pl.BlockSpec((H, H), lambda i: (0, 0), pipeline_mode=const_buf),   # w2
                pl.BlockSpec((1, H), lambda i: (0, 0), pipeline_mode=const_buf),   # b2
            ],
            out_specs=pl.BlockSpec((tile, H), lambda i: (i, 0)),
        ),
        compiler_params=pltpu.CompilerParams(
            dimension_semantics=("parallel",),      # row axis shards across v7x's 2 TCs
            vmem_limit_bytes=vmem_limit,
        ),
    )(x2d, gate2d, w1_mm, b1_2d, w2_mm, b2_2d)

    return out2d[:rows].reshape(B, S, H)


def _reference_f32(feature, mask, w1, b1, w2, b2):
    gate = jax.nn.sigmoid(mask)
    gated = gate * feature
    h = jnp.maximum(gated @ w1.T + b1, 0.0)
    return h @ w2.T + b2 + gated


def _reference_bf16(feature, mask, w1, b1, w2, b2):
    # Mirrors the kernel's dtype choices: bf16 MXU operands, f32 accumulation,
    # f32 residual / bias adds.
    gate = jax.nn.sigmoid(mask)
    gated = gate * feature
    h = jnp.dot(gated.astype(jnp.bfloat16), w1.T.astype(jnp.bfloat16),
                preferred_element_type=jnp.float32) + b1
    h = jnp.maximum(h, 0.0)
    y = jnp.dot(h.astype(jnp.bfloat16), w2.T.astype(jnp.bfloat16),
                preferred_element_type=jnp.float32)
    return y + b2 + gated


if __name__ == "__main__":
    B, S, H = 2, 8, 128   # small shapes; H plays the role of hidden_size=1024

    key = jax.random.PRNGKey(0)
    k_feat, k_w1, k_b1, k_w2, k_b2 = jax.random.split(key, 5)

    feature = jax.random.normal(k_feat, (B, S, H), dtype=jnp.float32)
    scale = 1.0 / jnp.sqrt(H)
    w1 = jax.random.uniform(k_w1, (H, H), minval=-scale, maxval=scale, dtype=jnp.float32)
    b1 = jax.random.uniform(k_b1, (H,), minval=-scale, maxval=scale, dtype=jnp.float32)
    w2 = jax.random.uniform(k_w2, (H, H), minval=-scale, maxval=scale, dtype=jnp.float32)
    b2 = jax.random.uniform(k_b2, (H,), minval=-scale, maxval=scale, dtype=jnp.float32)
    mask = jnp.zeros((H,), dtype=jnp.float32)   # PyTorch init: zeros

    run = jax.jit(functools.partial(image_adapter, tile_rows=256))
    out = jax.block_until_ready(run(feature, mask, w1, b1, w2, b2))

    assert out.shape == (B, S, H)

    ref_bf16 = _reference_bf16(feature.reshape(-1, H), mask, w1, b1, w2, b2).reshape(B, S, H)
    assert jnp.allclose(out, ref_bf16, atol=2e-3, rtol=2e-3), "mismatch vs bf16-matmul reference"

    ref_f32 = _reference_f32(feature.reshape(-1, H), mask, w1, b1, w2, b2).reshape(B, S, H)
    assert jnp.allclose(out, ref_f32, atol=3e-2, rtol=3e-2), "mismatch vs f32 reference"

    print("KERNEL_OK")
</pallas_src>

<mosaic_0001>
module attributes {stable_mosaic.version = 11 : i64} {
  func.func @_adapter_kernel(%arg0: i32, %arg1: memref<16x128xf32, #tpu.memory_space<vmem>>, %arg2: memref<1x128xf32, #tpu.memory_space<vmem>>, %arg3: memref<128x128xbf16, #tpu.memory_space<vmem>>, %arg4: memref<1x128xf32, #tpu.memory_space<vmem>>, %arg5: memref<128x128xbf16, #tpu.memory_space<vmem>>, %arg6: memref<1x128xf32, #tpu.memory_space<vmem>>, %arg7: memref<16x128xf32, #tpu.memory_space<vmem>>) attributes {dimension_semantics = [#tpu.dimension_semantics<parallel>], iteration_bounds = array<i64: 1>, scalar_prefetch = 0 : i64, scratch_operands = 0 : i64, tpu.core_type = #tpu.core_type<tc>, window_params = [{transform_indices = @transform_0, window_bounds = array<i64: 16, 128>}, {pipeline_mode = #tpu.pipeline_mode<synchronous>, transform_indices = @transform_1, window_bounds = array<i64: 1, 128>}, {pipeline_mode = #tpu.pipeline_mode<synchronous>, transform_indices = @transform_2, window_bounds = array<i64: 128, 128>}, {pipeline_mode = #tpu.pipeline_mode<synchronous>, transform_indices = @transform_3, window_bounds = array<i64: 1, 128>}, {pipeline_mode = #tpu.pipeline_mode<synchronous>, transform_indices = @transform_4, window_bounds = array<i64: 128, 128>}, {pipeline_mode = #tpu.pipeline_mode<synchronous>, transform_indices = @transform_5, window_bounds = array<i64: 1, 128>}, {transform_indices = @transform_6, window_bounds = array<i64: 16, 128>}]} {
    %c0 = arith.constant 0 : index
    %c0_0 = arith.constant 0 : index
    %0 = vector.load %arg2[%c0, %c0_0] : memref<1x128xf32, #tpu.memory_space<vmem>>, vector<1x128xf32>
    %c0_1 = arith.constant 0 : index
    %c0_2 = arith.constant 0 : index
    %1 = vector.load %arg1[%c0_1, %c0_2] : memref<16x128xf32, #tpu.memory_space<vmem>>, vector<16x128xf32>
    %2 = vector.broadcast %0 : vector<1x128xf32> to vector<16x128xf32>
    %3 = arith.mulf %1, %2 : vector<16x128xf32>
    %4 = arith.truncf %3 : vector<16x128xf32> to vector<16x128xbf16>
    %c0_3 = arith.constant 0 : index
    %c0_4 = arith.constant 0 : index
    %5 = vector.load %arg3[%c0_3, %c0_4] : memref<128x128xbf16, #tpu.memory_space<vmem>>, vector<128x128xbf16>
    %cst = arith.constant dense<0.000000e+00> : vector<16x128xf32>
    %6 = tpu.matmul %4, %5, %cst {dimension_numbers = #tpu.dot_dimension_numbers<[1], [1], [0], [0], [0, 0, 1, 0], [], []>} : vector<16x128xbf16>, vector<128x128xbf16>, vector<16x128xf32> -> vector<16x128xf32>
    %c0_5 = arith.constant 0 : index
    %c0_6 = arith.constant 0 : index
    %7 = vector.load %arg4[%c0_5, %c0_6] : memref<1x128xf32, #tpu.memory_space<vmem>>, vector<1x128xf32>
    %8 = vector.broadcast %7 : vector<1x128xf32> to vector<16x128xf32>
    %9 = arith.addf %6, %8 : vector<16x128xf32>
    %cst_7 = arith.constant 0.000000e+00 : f32
    %10 = vector.broadcast %cst_7 : f32 to vector<16x128xf32>
    %11 = arith.maximumf %9, %10 : vector<16x128xf32>
    %12 = arith.truncf %11 : vector<16x128xf32> to vector<16x128xbf16>
    %c0_8 = arith.constant 0 : index
    %c0_9 = arith.constant 0 : index
    %13 = vector.load %arg5[%c0_8, %c0_9] : memref<128x128xbf16, #tpu.memory_space<vmem>>, vector<128x128xbf16>
    %cst_10 = arith.constant dense<0.000000e+00> : vector<16x128xf32>
    %14 = tpu.matmul %12, %13, %cst_10 {dimension_numbers = #tpu.dot_dimension_numbers<[1], [1], [0], [0], [0, 0, 1, 0], [], []>} : vector<16x128xbf16>, vector<128x128xbf16>, vector<16x128xf32> -> vector<16x128xf32>
    %c0_11 = arith.constant 0 : index
    %c0_12 = arith.constant 0 : index
    %15 = vector.load %arg6[%c0_11, %c0_12] : memref<1x128xf32, #tpu.memory_space<vmem>>, vector<1x128xf32>
    %16 = vector.broadcast %15 : vector<1x128xf32> to vector<16x128xf32>
    %17 = arith.addf %14, %16 : vector<16x128xf32>
    %18 = arith.addf %17, %3 : vector<16x128xf32>
    %c0_13 = arith.constant 0 : index
    %c0_14 = arith.constant 0 : index
    %19 = vector.load %arg7[%c0_13, %c0_14] : memref<16x128xf32, #tpu.memory_space<vmem>>, vector<16x128xf32>
    tpu.vector_store %arg7[%c0_13, %c0_14], %18 {strides = array<i32>} : memref<16x128xf32, #tpu.memory_space<vmem>>, vector<16x128xf32>,
    return
  }
  func.func @transform_0(%arg0: i32) -> (i32, i32) {
    %c0_i32 = arith.constant 0 : i32
    %c0_i32_0 = arith.constant 0 : i32
    return %arg0, %c0_i32 : i32, i32
  }
  func.func @transform_1(%arg0: i32) -> (i32, i32) {
    %c0_i32 = arith.constant 0 : i32
    %c0_i32_0 = arith.constant 0 : i32
    %c0_i32_1 = arith.constant 0 : i32
    return %c0_i32, %c0_i32_0 : i32, i32
  }
  func.func @transform_2(%arg0: i32) -> (i32, i32) {
    %c0_i32 = arith.constant 0 : i32
    %c0_i32_0 = arith.constant 0 : i32
    %c0_i32_1 = arith.constant 0 : i32
    return %c0_i32, %c0_i32_0 : i32, i32
  }
  func.func @transform_3(%arg0: i32) -> (i32, i32) {
    %c0_i32 = arith.constant 0 : i32
    %c0_i32_0 = arith.constant 0 : i32
    %c0_i32_1 = arith.constant 0 : i32
    return %c0_i32, %c0_i32_0 : i32, i32
  }
  func.func @transform_4(%arg0: i32) -> (i32, i32) {
    %c0_i32 = arith.constant 0 : i32
    %c0_i32_0 = arith.constant 0 : i32
    %c0_i32_1 = arith.constant 0 : i32
    return %c0_i32, %c0_i32_0 : i32, i32
  }
  func.func @transform_5(%arg0: i32) -> (i32, i32) {
    %c0_i32 = arith.constant 0 : i32
    %c0_i32_0 = arith.constant 0 : i32
    %c0_i32_1 = arith.constant 0 : i32
    return %c0_i32, %c0_i32_0 : i32, i32
  }
  func.func @transform_6(%arg0: i32) -> (i32, i32) {
    %c0_i32 = arith.constant 0 : i32
    %c0_i32_0 = arith.constant 0 : i32
    return %arg0, %c0_i32 : i32, i32
  }
}

</mosaic_0001>

<bundles_post_ra>
// kernel: image_adapter.1
= control target key start
LH: loop header
LB: loop body
LE: loop exit
PB: predicated region body
PF: predicated region fallthrough
CT: control target
= control target key end

     0   :  { %v404_v1 = vmov 0.0   ;;  %vm405_vm0 = vmmov 0   ;;  %s510_s0 = inlined_call_operand.vmem [shape: f32[16,128], index: 0, kind: input, shape index: {}]   ;;  %s511_s1 = inlined_call_operand.vmem [shape: f32[1,128], index: 1, kind: input, shape index: {}]   ;;  %s512_s2 = inlined_call_operand.vmem [shape: bf16[128,128], index: 2, kind: input, shape index: {}]   ;;  %s513_s3 = inlined_call_operand.vmem [shape: f32[1,128], index: 3, kind: input, shape index: {}]   ;;  %s514_s4 = inlined_call_operand.vmem [shape: bf16[128,128], index: 4, kind: input, shape index: {}]   ;;  %s515_s5 = inlined_call_operand.vmem [shape: f32[1,128], index: 5, kind: input, shape index: {}]   ;;  %s516_s6 = inlined_call_operand.hbm [shape: f32[16,128], index: 6, kind: output, shape index: {}]  }
   0x1   :  { %v366_v0 = vld [vmem:[%s512_s2 + $0x38] sm:$0xff]   ;;  %321 = vmatprep.subr.bf16.mxu0 %v404_v1  ;;  %341 = vmatprep.subr.bf16.mxu1 %v404_v1  ;;  %v367_v2 = vld [vmem:[%s512_s2 + $0x30] sm:$0xff]   ;;  %v368_v4 = vld [vmem:[%s512_s2 + $0x28] sm:$0xff]  }
   0x2   :  { %322 = vmatpush3.bf16.xpose.msra.mxu0 %v366_v0  ;;  %337 = vmatprep.mubr.msk.bf16.mxu0 %vm405_vm0, %v404_v1  ;;  %v374_v3 = vld [vmem:[%s514_s4 + $0x38] sm:$0xff]   ;;  %v375_v5 = vld [vmem:[%s514_s4 + $0x30] sm:$0xff]  }
   0x3   :  { %323 = vmatprep.subr.bf16.mxu0 %v404_v1  ;;  %357 = vmatprep.mubr.msk.bf16.mxu1 %vm405_vm0, %v404_v1 }
   0x4   :  { %342 = vmatpush3.bf16.xpose.msra.mxu1 %v374_v3 }
   0x5   :  { %343 = vmatprep.subr.bf16.mxu1 %v404_v1 }
   0xa   :  { %324 = vmatpush3.bf16.xpose.msra.mxu0 %v367_v2 }
   0xb   :  { %325 = vmatprep.subr.bf16.mxu0 %v404_v1 }
   0xc   :  { %11 = vsyncpa [#allocation3], 0  ;;  %344 = vmatpush3.bf16.xpose.msra.mxu1 %v375_v5  ;;  %v369_v6 = vld [vmem:[%s512_s2 + $0x20] sm:$0xff]   ;;  %v376_v7 = vld [vmem:[%s514_s4 + $0x28] sm:$0xff]  }
   0xd   :  { %345 = vmatprep.subr.bf16.mxu1 %v404_v1  ;;  %v370_v8 = vld [vmem:[%s512_s2 + $0x18] sm:$0xff]   ;;  %v377_v9 = vld [vmem:[%s514_s4 + $0x20] sm:$0xff]   ;;  %v371_v10 = vld [vmem:[%s512_s2 + $0x10] sm:$0xff]  }
   0xe   :  { %v378_v11 = vld [vmem:[%s514_s4 + $0x18] sm:$0xff]   ;;  %v372_v12 = vld [vmem:[%s512_s2 + $0x8] sm:$0xff]   ;;  %v379_v13 = vld [vmem:[%s514_s4 + $0x10] sm:$0xff]  }
   0xf   :  { %v373_v14 = vld [vmem:[%s512_s2] sm:$0xff]   ;;  %v27_v17 = vld [vmem:[%s510_s0 + $0x8] sm:$0xff] }
  0x10   :  { %v284_v15 = vld [vmem:[%s511_s1] ss:$0 sm:$0xff]  ;;  %v380_v18 = vld [vmem:[%s514_s4 + $0x8] sm:$0xff]  }
  0x11   :  { %v26_v16 = vld [vmem:[%s510_s0] sm:$0xff]  ;;  %v35_v20 = vmul.f32 %v284_v15, %v27_v17 }
  0x12   :  { %326 = vmatpush3.bf16.xpose.msra.mxu0 %v368_v4  ;;  %v34_v19 = vmul.f32 %v284_v15, %v26_v16  ;;  %v381_v22 = vld [vmem:[%s514_s4] sm:$0xff]   ;;  %s406_s4 = smov [#allocation2]  }
  0x13   :  { %327 = vmatprep.subr.bf16.mxu0 %v404_v1  ;;  %v285_v23 = vld [vmem:[%s513_s3] ss:$0 sm:$0xff]  ;;  %s273_s3 = sshll.u32 %s406_s4, 4  ;;  %s274_s3 = int_to_ptr.vmem [resolvable:$true] %s273_s3 }
  0x14   :  { %346 = vmatpush3.bf16.xpose.msra.mxu1 %v376_v7  ;;  %v36_v21 = vpack.c.bf16 %v35_v20, %v34_v19  ;;  %v294_v33 = vld [vmem:[%s515_s5] ss:$0 sm:$0xff]  ;;  %s382_s12 = scalar_lea.vmem %s274_s3, 256  ;;  %p387_p1 = scmp.lt.s32.totalorder %s274_s3, %s274_s3 }
  0x15   :  { %347 = vmatprep.subr.bf16.mxu1 %v404_v1  ;;  %p383_p0 = scmp.ne.s32.totalorder %s274_s3, %s382_s12  ;;  %p388_p2 = scmp.lt.s32.totalorder %s382_s12, %s382_s12 }
  0x17   :  { %p389_p3 = por %p388_p2, %p387_p1 }
  0x19   :  { %p390_p4 = pnand %p389_p3, %p383_p0 }
  0x1a   :  { %328 = vmatpush3.bf16.xpose.msra.mxu0 %v369_v6 }
  0x1b   :  { %329 = vmatprep.subr.bf16.mxu0 %v404_v1 }
  0x1c   :  { %348 = vmatpush3.bf16.xpose.msra.mxu1 %v377_v9 }
  0x1d   :  { %349 = vmatprep.subr.bf16.mxu1 %v404_v1 }
  0x22   :  { %330 = vmatpush3.bf16.xpose.msra.mxu0 %v370_v8 }
  0x23   :  { %331 = vmatprep.subr.bf16.mxu0 %v404_v1 }
  0x24   :  { %350 = vmatpush3.bf16.xpose.msra.mxu1 %v378_v11 }
  0x25   :  { %351 = vmatprep.subr.bf16.mxu1 %v404_v1 }
  0x2a   :  { %332 = vmatpush3.bf16.xpose.msra.mxu0 %v371_v10 }
  0x2b   :  { %333 = vmatprep.subr.bf16.mxu0 %v404_v1 }
  0x2c   :  { %352 = vmatpush3.bf16.xpose.msra.mxu1 %v379_v13 }
  0x2d   :  { %353 = vmatprep.subr.bf16.mxu1 %v404_v1 }
  0x32   :  { %334 = vmatpush3.bf16.xpose.msra.mxu0 %v372_v12 }
  0x33   :  { %335 = vmatprep.subr.bf16.mxu0 %v404_v1 }
  0x34   :  { %354 = vmatpush3.bf16.xpose.msra.mxu1 %v380_v18 }
  0x35   :  { %355 = vmatprep.subr.bf16.mxu1 %v404_v1 }
  0x3a   :  { %336 = vmatpush3.bf16.xpose.msra.mxu0 %v373_v14 }
  0x3c   :  { %356 = vmatpush3.bf16.xpose.msra.mxu1 %v381_v22 }
  0x41   :  { %338 = vmatmul.mubr.bf16.vlgmr.msra.gmra.mxu0 %v36_v21 }
 0x101   :  { %v142_v24 = vpop.f32.mrf.mxu0 }
 0x102   :  { %v143_v26 = vadd.f32 %v285_v23, %v142_v24 }
 0x103   :  { %v339_v25 = vpop.f32.mrf.mxu0 }
 0x104   :  { %v149_v30 = vmax.f32 %v143_v26, 0.0 }
 0x105   :  { %v145_v27 = vpop.f32.mrf.mxu0 }
 0x106   :  { %v146_v28 = vadd.f32 %v285_v23, %v145_v27 }
 0x107   :  { %v340_v29 = vpop.f32.mrf.mxu0 }
 0x108   :  { %v150_v31 = vmax.f32 %v146_v28, 0.0 }
 0x10a   :  { %v151_v32 = vpack.c.bf16 %v150_v31, %v149_v30 }
 0x10c   :  { %358 = vmatmul.mubr.bf16.vlgmr.msra.gmra.mxu1 %v151_v32 }
 0x1cc   :  { %v257_v34 = vpop.f32.mrf.mxu1 }
 0x1cd   :  { %v258_v35 = vadd.f32 %v294_v33, %v257_v34 }
 0x1ce   :  { %v359_v36 = vpop.f32.mrf.mxu1 }
 0x1cf   :  { %v264_v37 = vadd.f32 %v258_v35, %v34_v19 }
 0x1d0   :  { %v260_v38 = vpop.f32.mrf.mxu1 }
 0x1d1   :  { %266 = vst [vmem:[#allocation2] sm:$0xff] %v264_v37  ;;  %v261_v39 = vadd.f32 %v294_v33, %v260_v38 }
 0x1d2   :  { %v360_v40 = vpop.f32.mrf.mxu1 }
 0x1d3   :  { %v265_v41 = vadd.f32 %v261_v39, %v35_v20 }
 0x1d5   :  { %267 = vst [vmem:[#allocation2 + $0x8] sm:$0xff] %v265_v41 }
 0x1d6   :  { %393 = shalt.err (!%p390_p4)
}
 0x1d7   :  { %s407_s5 = smov 128   ;;  %s408_s13 = smov 8  }
 0x1d8   :  { %279 = dma.vmem_to_hbm [thread:$0]  %s274_s3, 256, %s516_s6, [#allocation3], %s407_s5, %s407_s5, %s408_s13  }
 0x1d9   :  { %402 = dma.done.wait [#allocation3], 256  }
 0x1da   :  { %403 = vsyncadd [#allocation3], 4294967040 }
 0x1db   :  { %283 = vsyncpa [#allocation3], 1 }

</bundles_post_ra>
